<compile_context>
chip_gen: v7x
topology: tpu7x:2x2x1
jax: 0.10.0
libtpu: 0.0.40
codegen_flags: <defaults>
</compile_context>

<pallas_src>
import jax
import jax.numpy as jnp
from jax.experimental import pallas as pl
from jax.experimental.pallas import tpu as pltpu


def _span_scorer_kernel(enc_ref, w_ref, b_ref, mask_ref, out_ref):
    # enc_ref : (TM, H)  encoder rows, native dtype (bf16) -> MXU
    # w_ref   : (H, 2)   span_scorer weight, same dtype as enc (replicated)
    # b_ref   : (1, 2)   f32 bias (replicated)
    # mask_ref: (TM, 1)  pointer mask, original dtype
    # out_ref : (TM, 2)  f32 masked span scores
    scores = jnp.dot(enc_ref[...], w_ref[...],
                     preferred_element_type=jnp.float32)          # (TM, 2) f32
    invalid = 1.0 - mask_ref[...].astype(jnp.float32)             # (TM, 1)
    # Single fused epilogue: bias add + mask penalty (matches torch semantics).
    out_ref[...] = (scores + b_ref[...] -
                    invalid * jnp.float32(1e20)).astype(out_ref.dtype)


def span_forward(roberta_enc, span_pointer_mask, w, b, *, tm=512):
    """Compute masked span scores.

    Args:
      roberta_enc:       [B, S, H] encoder output (any float dtype, e.g. bf16).
      span_pointer_mask: [B, S]    mask (1 = valid token, 0 = invalid).
      w:                 [H, 2]    span_scorer weight (torch weight.T).
      b:                 [2]       span_scorer bias.
      tm:                row tile size (rows of the flattened B*S axis).

    Returns:
      span_scores: [B, S, 2] float32, with -1e20 penalty on invalid positions.
    """
    B, S, H = roberta_enc.shape
    M = B * S

    # Free row-major reshapes — no dtype casts, no extra HBM passes on enc/mask.
    enc2 = roberta_enc.reshape(M, H)
    mask2 = span_pointer_mask.reshape(M, 1)
    w2 = w.astype(roberta_enc.dtype)            # tiny (H*2 elements)
    b2 = b.reshape(1, 2).astype(jnp.float32)    # tiny

    # Sublane-aligned row tile, capped at M. (tm == M uses the full extent.)
    tm = max(8, min(tm, M))
    tm = min(M, ((tm + 7) // 8) * 8)
    num_tiles = pl.cdiv(M, tm)
    Mp = num_tiles * tm
    if Mp != M:
        enc2 = jnp.pad(enc2, ((0, Mp - M), (0, 0)))
        mask2 = jnp.pad(mask2, ((0, Mp - M), (0, 0)))

    grid_spec = pltpu.PrefetchScalarGridSpec(
        num_scalar_prefetch=0,
        grid=(num_tiles,),
        in_specs=[
            pl.BlockSpec((tm, H), lambda i: (i, 0)),   # encoder rows (streamed)
            pl.BlockSpec((H, 2), lambda i: (0, 0)),    # weight (replicated)
            pl.BlockSpec((1, 2), lambda i: (0, 0)),    # bias (replicated)
            pl.BlockSpec((tm, 1), lambda i: (i, 0)),   # pointer mask rows
        ],
        out_specs=pl.BlockSpec((tm, 2), lambda i: (i, 0)),
    )

    out = pl.pallas_call(
        _span_scorer_kernel,
        out_shape=jax.ShapeDtypeStruct((Mp, 2), jnp.float32),
        grid_spec=grid_spec,
        compiler_params=pltpu.CompilerParams(
            dimension_semantics=("parallel",),
        ),
    )(enc2, w2, b2, mask2)

    return out[:M].reshape(B, S, 2)


def span_forward_ref(roberta_enc, span_pointer_mask, w, b):
    """Pure-JAX reference (mirrors the PyTorch semantics, bf16 matmul / f32 acc)."""
    scores = jnp.einsum("bsh,hk->bsk", roberta_enc, w.astype(roberta_enc.dtype),
                        preferred_element_type=jnp.float32)
    scores = scores + b[None, None, :].astype(jnp.float32)
    invalid = 1.0 - span_pointer_mask.astype(jnp.float32)
    return scores - invalid[:, :, None] * jnp.float32(1e20)


if __name__ == "__main__":
    # Small synthetic shapes consistent with the module:
    # batch=2, seq=128, bert_hidden_size=256, span_scorer: Linear(H, 2).
    B, S, H = 2, 128, 256

    key = jax.random.PRNGKey(0)
    k_enc, k_w, k_b = jax.random.split(key, 3)

    # Encoder output kept in its native bf16 — no f32 upcast before the kernel.
    roberta_enc = jax.random.normal(k_enc, (B, S, H),
                                    dtype=jnp.float32).astype(jnp.bfloat16)
    # Deterministic span_scorer params (nn.Linear(H, 2, bias=True)).
    w = jax.random.normal(k_w, (H, 2), dtype=jnp.float32) * 0.02
    b = jax.random.normal(k_b, (2,), dtype=jnp.float32) * 0.02
    # Pointer mask: first ~3/4 (resp. 1/2) of each sequence valid.
    valid_len = jnp.array([S * 3 // 4, S // 2], dtype=jnp.int32)
    pos = jnp.arange(S)[None, :]
    span_pointer_mask = (pos < valid_len[:, None]).astype(jnp.float32)

    out = jax.block_until_ready(span_forward(roberta_enc, span_pointer_mask, w, b))

    ref = span_forward_ref(roberta_enc, span_pointer_mask, w, b)
    assert out.shape == (B, S, 2), out.shape
    assert jnp.allclose(out, ref, rtol=2e-2, atol=2e-2), "mismatch vs reference"

    print("KERNEL_OK")
</pallas_src>

<mosaic_0001>
module attributes {stable_mosaic.version = 11 : i64} {
  func.func @_span_scorer_kernel(%arg0: i32, %arg1: memref<256x256xbf16, #tpu.memory_space<vmem>>, %arg2: memref<256x2xbf16, #tpu.memory_space<vmem>>, %arg3: memref<1x2xf32, #tpu.memory_space<vmem>>, %arg4: memref<256x1xf32, #tpu.memory_space<vmem>>, %arg5: memref<256x2xf32, #tpu.memory_space<vmem>>) attributes {dimension_semantics = [#tpu.dimension_semantics<parallel>], iteration_bounds = array<i64: 1>, scalar_prefetch = 0 : i64, scratch_operands = 0 : i64, tpu.core_type = #tpu.core_type<tc>, window_params = [{transform_indices = @transform_0, window_bounds = array<i64: 256, 256>}, {pipeline_mode = #tpu.pipeline_mode<synchronous>, transform_indices = @transform_1, window_bounds = array<i64: 256, 2>}, {pipeline_mode = #tpu.pipeline_mode<synchronous>, transform_indices = @transform_2, window_bounds = array<i64: 1, 2>}, {transform_indices = @transform_3, window_bounds = array<i64: 256, 1>}, {transform_indices = @transform_4, window_bounds = array<i64: 256, 2>}]} {
    %c0 = arith.constant 0 : index
    %c0_0 = arith.constant 0 : index
    %0 = vector.load %arg1[%c0, %c0_0] : memref<256x256xbf16, #tpu.memory_space<vmem>>, vector<256x256xbf16>
    %c0_1 = arith.constant 0 : index
    %c0_2 = arith.constant 0 : index
    %1 = vector.load %arg2[%c0_1, %c0_2] : memref<256x2xbf16, #tpu.memory_space<vmem>>, vector<256x2xbf16>
    %cst = arith.constant dense<0.000000e+00> : vector<256x2xf32>
    %2 = tpu.matmul %0, %1, %cst {dimension_numbers = #tpu.dot_dimension_numbers<[1], [0], [0], [1], [0, 0, 1, 1], [], []>} : vector<256x256xbf16>, vector<256x2xbf16>, vector<256x2xf32> -> vector<256x2xf32>
    %c0_3 = arith.constant 0 : index
    %c0_4 = arith.constant 0 : index
    %3 = vector.load %arg4[%c0_3, %c0_4] : memref<256x1xf32, #tpu.memory_space<vmem>>, vector<256x1xf32>
    %cst_5 = arith.constant 1.000000e+00 : f32
    %4 = vector.broadcast %cst_5 : f32 to vector<256x1xf32>
    %5 = arith.subf %4, %3 : vector<256x1xf32>
    %c0_6 = arith.constant 0 : index
    %c0_7 = arith.constant 0 : index
    %6 = vector.load %arg3[%c0_6, %c0_7] : memref<1x2xf32, #tpu.memory_space<vmem>>, vector<1x2xf32>
    %7 = vector.broadcast %6 : vector<1x2xf32> to vector<256x2xf32>
    %8 = arith.addf %2, %7 : vector<256x2xf32>
    %cst_8 = arith.constant 1.000000e+20 : f32
    %9 = vector.broadcast %cst_8 : f32 to vector<256x1xf32>
    %10 = arith.mulf %5, %9 : vector<256x1xf32>
    %11 = vector.broadcast %10 : vector<256x1xf32> to vector<256x2xf32>
    %12 = arith.subf %8, %11 : vector<256x2xf32>
    %c0_9 = arith.constant 0 : index
    %c0_10 = arith.constant 0 : index
    %13 = vector.load %arg5[%c0_9, %c0_10] : memref<256x2xf32, #tpu.memory_space<vmem>>, vector<256x2xf32>
    tpu.vector_store %arg5[%c0_9, %c0_10], %12 {strides = array<i32>} : memref<256x2xf32, #tpu.memory_space<vmem>>, vector<256x2xf32>,
    return
  }
  func.func @transform_0(%arg0: i32) -> (i32, i32) {
    %c0_i32 = arith.constant 0 : i32
    %c0_i32_0 = arith.constant 0 : i32
    return %arg0, %c0_i32 : i32, i32
  }
  func.func @transform_1(%arg0: i32) -> (i32, i32) {
    %c0_i32 = arith.constant 0 : i32
    %c0_i32_0 = arith.constant 0 : i32
    %c0_i32_1 = arith.constant 0 : i32
    return %c0_i32, %c0_i32_0 : i32, i32
  }
  func.func @transform_2(%arg0: i32) -> (i32, i32) {
    %c0_i32 = arith.constant 0 : i32
    %c0_i32_0 = arith.constant 0 : i32
    %c0_i32_1 = arith.constant 0 : i32
    return %c0_i32, %c0_i32_0 : i32, i32
  }
  func.func @transform_3(%arg0: i32) -> (i32, i32) {
    %c0_i32 = arith.constant 0 : i32
    %c0_i32_0 = arith.constant 0 : i32
    return %arg0, %c0_i32 : i32, i32
  }
  func.func @transform_4(%arg0: i32) -> (i32, i32) {
    %c0_i32 = arith.constant 0 : i32
    %c0_i32_0 = arith.constant 0 : i32
    return %arg0, %c0_i32 : i32, i32
  }
}

</mosaic_0001>

<bundles_post_ra>
// kernel: tpu_custom_call.1
= control target key start
LH: loop header
LB: loop body
LE: loop exit
PB: predicated region body
PF: predicated region fallthrough
CT: control target
= control target key end

     0   :  { %v1075_v1 = vmov 0   ;;  %vm794_vm0 = vcmask 15360   ;;  %s1548_s1 = inlined_call_operand.vmem [shape: bf16[256,2], index: 1, kind: input, shape index: {}]   ;;  %s1549_s0 = inlined_call_operand.vmem [shape: bf16[256,256], index: 0, kind: input, shape index: {}]   ;;  %s1550_s3 = inlined_call_operand.vmem [shape: f32[256,1], index: 3, kind: input, shape index: {}]   ;;  %s1551_s2 = inlined_call_operand.vmem [shape: f32[1,2], index: 2, kind: input, shape index: {}]   ;;  %s1552_s4 = inlined_call_operand.vmem [shape: f32[256,2], index: 4, kind: output, shape index: {}]  }
   0x1   :  { %v1011_v0 = vld [vmem:[%s1548_s1 + $0x40] sm:$0xff]   ;;  %1010 = vset.pattern.permute.xlu1 %v1075_v1  ;;  %1009 = vset.pattern.permute.xlu0 %v1075_v1  ;;  %v1013_v3 = vld [vmem:[%s1548_s1 + $0x48] sm:$0xff]   ;;  %v1015_v5 = vld [vmem:[%s1548_s1 + $0x50] sm:$0xff]  }
   0x2   :  { %v1012_v2 = vld [vmem:[%s1548_s1] sm:$0xff]   ;;  %880 = vmatprep.subr.bf16.mxu0 %v1011_v0  ;;  %992 = vmatprep.subr.bf16.mxu1 %v1011_v0  ;;  %v1014_v4 = vld [vmem:[%s1548_s1 + $0x8] sm:$0xff]   ;;  %v1016_v6 = vld [vmem:[%s1548_s1 + $0x10] sm:$0xff]  }
   0x3   :  { %881 = vmatpush3.bf16.msra.mxu0 %v1012_v2  ;;  %1000 = vmatpush3.bf16.msra.mxu1 %v1012_v2  ;;  %v1017_v7 = vld [vmem:[%s1548_s1 + $0x58] sm:$0xff]   ;;  %v1019_v9 = vld [vmem:[%s1548_s1 + $0x60] sm:$0xff]   ;;  %v1021_v11 = vld [vmem:[%s1548_s1 + $0x68] sm:$0xff]  }
   0x4   :  { %882 = vmatprep.subr.bf16.mxu0 %v1013_v3  ;;  %993 = vmatprep.subr.bf16.mxu1 %v1013_v3  ;;  %v1018_v8 = vld [vmem:[%s1548_s1 + $0x18] sm:$0xff]   ;;  %v1020_v10 = vld [vmem:[%s1548_s1 + $0x20] sm:$0xff]   ;;  %v1022_v14 = vld [vmem:[%s1548_s1 + $0x28] sm:$0xff]  }
   0x5   :  { %v1029_v12 = vld [vmem:[%s1549_s0 + $0x4] ss:$8 sps:$4 sm:$0xff]   ;;  %v1023_v15 = vld [vmem:[%s1548_s1 + $0x70] sm:$0xff]   ;;  %v1025_v17 = vld [vmem:[%s1548_s1 + $0x78] sm:$0xff]  }
   0x6   :  { %v1032_v13 = vld [vmem:[%s1549_s0 + $0x84] ss:$8 sps:$4 sm:$0xff]   ;;  %441 = vmatprep.mubr.bf16.mxu0 %v1029_v12  ;;  %v1024_v16 = vld [vmem:[%s1548_s1 + $0x30] sm:$0xff]   ;;  %v1026_v18 = vld [vmem:[%s1548_s1 + $0x38] sm:$0xff]  }
   0x7   :  { %883 = vmatpush3.bf16.msra.mxu0 %v1014_v4  ;;  %1001 = vmatpush3.bf16.msra.mxu1 %v1014_v4  ;;  %v84_v19 = vld [vmem:[%s1550_s3 + $0x10] sm:$0xff]  ;;  %v82_v21 = vld [vmem:[%s1550_s3] sm:$0xff]  ;;  %v85_v22 = vld [vmem:[%s1550_s3 + $0x18] sm:$0xff] }
   0x8   :  { %884 = vmatprep.subr.bf16.mxu0 %v1015_v5  ;;  %994 = vmatprep.subr.bf16.mxu1 %v1015_v5  ;;  %v116_v20 = vsub.f32 1.0, %v84_v19  ;;  %v83_v23 = vld [vmem:[%s1550_s3 + $0x8] sm:$0xff]  ;;  %v114_v24 = vsub.f32 1.0, %v82_v21  ;;  %v117_v25 = vsub.f32 1.0, %v85_v22  ;;  %v1033_v32 = vld [vmem:[%s1549_s0 + $0x14] ss:$8 sps:$4 sm:$0xff]  }
   0x9   :  { %505 = vmatprep.mubr.bf16.mxu1 %v1032_v13  ;;  %v115_v26 = vsub.f32 1.0, %v83_v23  ;;  %v87_v28 = vld [vmem:[%s1550_s3 + $0x28] sm:$0xff]  ;;  %v1035_v33 = vld [vmem:[%s1549_s0 + $0x94] ss:$8 sps:$4 sm:$0xff]   ;;  %v86_v37 = vld [vmem:[%s1550_s3 + $0x20] sm:$0xff] }
   0xa   :  { %v572_v27 = vmul.f32 1e+20, %v116_v20  ;;  %v1027_v29 = vld [vmem:[%s1549_s0] ss:$8 sps:$4 sm:$0xff]   ;;  %v570_v31 = vmul.f32 1e+20, %v114_v24 }
   0xb   :  { %885 = vmatpush3.bf16.msra.mxu0 %v1016_v6  ;;  %1002 = vmatpush3.bf16.msra.mxu1 %v1016_v6  ;;  %v1030_v30 = vld [vmem:[%s1549_s0 + $0x80] ss:$8 sps:$4 sm:$0xff]   ;;  %v573_v34 = vmul.f32 1e+20, %v117_v25  ;;  %v571_v35 = vmul.f32 1e+20, %v115_v26 }
   0xc   :  { %886 = vmatprep.subr.bf16.mxu0 %v1017_v7  ;;  %995 = vmatprep.subr.bf16.mxu1 %v1017_v7  ;;  %v119_v36 = vsub.f32 1.0, %v87_v28  ;;  %v89_v38 = vld [vmem:[%s1550_s3 + $0x38] sm:$0xff]  ;;  %v88_v39 = vld [vmem:[%s1550_s3 + $0x30] sm:$0xff]  ;;  %v118_v40 = vsub.f32 1.0, %v86_v37  ;;  %v1039_v47 = vld [vmem:[%s1549_s0 + $0x24] ss:$8 sps:$4 sm:$0xff]  }
   0xd   :  { %614 = vperm.xlu1 %1010, %v572_v27   ;;  %604 = vperm.xlu0 %1009, %v570_v31   ;;  %v121_v41 = vsub.f32 1.0, %v89_v38  ;;  %v1037_v42 = vld [vmem:[%s1549_s0 + $0x10] ss:$8 sps:$4 sm:$0xff]   ;;  %v120_v46 = vsub.f32 1.0, %v88_v39  ;;  %v91_v48 = vld [vmem:[%s1550_s3 + $0x48] sm:$0xff]  ;;  %v90_v49 = vld [vmem:[%s1550_s3 + $0x40] sm:$0xff] }
   0xe   :  { %v1038_v43 = vld [vmem:[%s1549_s0 + $0x90] ss:$8 sps:$4 sm:$0xff]   ;;  %v575_v44 = vmul.f32 1e+20, %v119_v36  ;;  %v574_v45 = vmul.f32 1e+20, %v118_v40 }
   0xf   :  { %887 = vmatpush3.bf16.msra.mxu0 %v1018_v8  ;;  %1003 = vmatpush3.bf16.msra.mxu1 %v1018_v8  ;;  %v1041_v50 = vld [vmem:[%s1549_s0 + $0xa4] ss:$8 sps:$4 sm:$0xff]   ;;  %v577_v51 = vmul.f32 1e+20, %v121_v41  ;;  %v576_v52 = vmul.f32 1e+20, %v120_v46 }
  0x10   :  { %888 = vmatprep.subr.bf16.mxu0 %v1019_v9  ;;  %996 = vmatprep.subr.bf16.mxu1 %v1019_v9  ;;  %v123_v53 = vsub.f32 1.0, %v91_v48  ;;  %v122_v54 = vsub.f32 1.0, %v90_v49  ;;  %v93_v55 = vld [vmem:[%s1550_s3 + $0x58] sm:$0xff]  ;;  %v92_v56 = vld [vmem:[%s1550_s3 + $0x50] sm:$0xff]  ;;  %v95_v61 = vld [vmem:[%s1550_s3 + $0x68] sm:$0xff] }
  0x11   :  { %619 = vperm.xlu1 %1010, %v573_v34   ;;  %609 = vperm.xlu0 %1009, %v571_v35   ;;  %v125_v57 = vsub.f32 1.0, %v93_v55  ;;  %v124_v60 = vsub.f32 1.0, %v92_v56  ;;  %v94_v62 = vld [vmem:[%s1550_s3 + $0x60] sm:$0xff]  ;;  %v1045_v1 = vld [vmem:[%s1549_s0 + $0x34] ss:$8 sps:$4 sm:$0xff]   ;;  %v127_v5 = vsub.f32 1.0, %v95_v61 }
  0x12   :  { %v579_v58 = vmul.f32 1e+20, %v123_v53  ;;  %v578_v59 = vmul.f32 1e+20, %v122_v54  ;;  %v1043_v63 = vld [vmem:[%s1549_s0 + $0x20] ss:$8 sps:$4 sm:$0xff]  }
  0x13   :  { %889 = vmatpush3.bf16.msra.mxu0 %v1020_v10  ;;  %1004 = vmatpush3.bf16.msra.mxu1 %v1020_v10  ;;  %v1044_v0 = vld [vmem:[%s1549_s0 + $0xa0] ss:$8 sps:$4 sm:$0xff]   ;;  %v1047_v2 = vld [vmem:[%s1549_s0 + $0xb4] ss:$8 sps:$4 sm:$0xff]   ;;  %v581_v3 = vmul.f32 1e+20, %v125_v57 }
  0x14   :  { %890 = vmatprep.subr.bf16.mxu0 %v1021_v11  ;;  %997 = vmatprep.subr.bf16.mxu1 %v1021_v11  ;;  %v580_v4 = vmul.f32 1e+20, %v124_v60  ;;  %v126_v6 = vsub.f32 1.0, %v94_v62  ;;  %v97_v7 = vld [vmem:[%s1550_s3 + $0x78] sm:$0xff]  ;;  %v96_v8 = vld [vmem:[%s1550_s3 + $0x70] sm:$0xff]  ;;  %v99_v13 = vld [vmem:[%s1550_s3 + $0x88] sm:$0xff] }
  0x15   :  { %629 = vperm.xlu1 %1010, %v575_v44   ;;  %624 = vperm.xlu0 %1009, %v574_v45   ;;  %v583_v9 = vmul.f32 1e+20, %v127_v5  ;;  %v129_v11 = vsub.f32 1.0, %v97_v7  ;;  %v128_v12 = vsub.f32 1.0, %v96_v8  ;;  %v131_v21 = vsub.f32 1.0, %v99_v13  ;;  %v101_v23 = vld [vmem:[%s1550_s3 + $0x98] sm:$0xff] }
  0x16   :  { %v582_v10 = vmul.f32 1e+20, %v126_v6  ;;  %v100_v24 = vld [vmem:[%s1550_s3 + $0x90] sm:$0xff]  ;;  %v133_v27 = vsub.f32 1.0, %v101_v23  ;;  %v1055_v31 = vld [vmem:[%s1549_s0 + $0x40] ss:$8 sps:$4 sm:$0xff]  }
  0x17   :  { %891 = vmatpush3.bf16.msra.mxu0 %v1022_v14  ;;  %1005 = vmatpush3.bf16.msra.mxu1 %v1022_v14  ;;  %v98_v14 = vld [vmem:[%s1550_s3 + $0x80] sm:$0xff]  ;;  %v585_v19 = vmul.f32 1e+20, %v129_v11  ;;  %v584_v20 = vmul.f32 1e+20, %v128_v12  ;;  %v132_v28 = vsub.f32 1.0, %v100_v24 }
  0x18   :  { %892 = vmatprep.subr.bf16.mxu0 %v1023_v15  ;;  %998 = vmatprep.subr.bf16.mxu1 %v1023_v15  ;;  %v1049_v15 = vld [vmem:[%s1549_s0 + $0x30] ss:$8 sps:$4 sm:$0xff]   ;;  %v130_v22 = vsub.f32 1.0, %v98_v14  ;;  %v587_v25 = vmul.f32 1e+20, %v131_v21  ;;  %v107_v45 = vld [vmem:[%s1550_s3 + $0xc8] sm:$0xff] }
  0x19   :  { %639 = vperm.xlu1 %1010, %v577_v51   ;;  %634 = vperm.xlu0 %1009, %v576_v52   ;;  %v1059_v34 = vld [vmem:[%s1549_s0 + $0xd4] ss:$8 sps:$4 sm:$0xff]   ;;  %v589_v35 = vmul.f32 1e+20, %v133_v27  ;;  %v588_v36 = vmul.f32 1e+20, %v132_v28 }
  0x1a   :  { %v586_v26 = vmul.f32 1e+20, %v130_v22  ;;  %v105_v39 = vld [vmem:[%s1550_s3 + $0xb8] sm:$0xff]  ;;  %v104_v40 = vld [vmem:[%s1550_s3 + $0xb0] sm:$0xff]  ;;  %v106_v46 = vld [vmem:[%s1550_s3 + $0xc0] sm:$0xff]  ;;  %v139_v53 = vsub.f32 1.0, %v107_v45 }
  0x1b   :  { %893 = vmatpush3.bf16.msra.mxu0 %v1024_v16  ;;  %1006 = vmatpush3.bf16.msra.mxu1 %v1024_v16  ;;  %v1050_v16 = vld [vmem:[%s1549_s0 + $0xb0] ss:$8 sps:$4 sm:$0xff]   ;;  %v136_v44 = vsub.f32 1.0, %v104_v40  ;;  %v1063_v49 = vld [vmem:[%s1549_s0 + $0x64] ss:$8 sps:$4 sm:$0xff]   ;;  %v138_v54 = vsub.f32 1.0, %v106_v46 }
  0x1c   :  { %894 = vmatprep.subr.bf16.mxu0 %v1025_v17  ;;  %999 = vmatprep.subr.bf16.mxu1 %v1025_v17  ;;  %v1051_v17 = vld [vmem:[%s1549_s0 + $0x44] ss:$8 sps:$4 sm:$0xff]   ;;  %v1062_v48 = vld [vmem:[%s1549_s0 + $0xd0] ss:$8 sps:$4 sm:$0xff]   ;;  %v595_v57 = vmul.f32 1e+20, %v139_v53 }
  0x1d   :  { %649 = vperm.xlu1 %1010, %v579_v58   ;;  %644 = vperm.xlu0 %1009, %v578_v59   ;;  %v592_v52 = vmul.f32 1e+20, %v136_v44  ;;  %v109_v55 = vld [vmem:[%s1550_s3 + $0xd8] sm:$0xff]  ;;  %v108_v56 = vld [vmem:[%s1550_s3 + $0xd0] sm:$0xff]  ;;  %v594_v58 = vmul.f32 1e+20, %v138_v54 }
  0x1e   :  { %v141_v59 = vsub.f32 1.0, %v109_v55  ;;  %v140_v60 = vsub.f32 1.0, %v108_v56  ;;  %v111_v61 = vld [vmem:[%s1550_s3 + $0xe8] sm:$0xff]  ;;  %v110_v62 = vld [vmem:[%s1550_s3 + $0xe0] sm:$0xff]  ;;  %v113_v7 = vld [vmem:[%s1550_s3 + $0xf8] sm:$0xff] }
  0x1f   :  { %895 = vmatpush3.bf16.msra.mxu0 %v1026_v18  ;;  %1007 = vmatpush3.bf16.msra.mxu1 %v1026_v18  ;;  %v1053_v18 = vld [vmem:[%s1549_s0 + $0xc4] ss:$8 sps:$4 sm:$0xff]   ;;  %v143_v5 = vsub.f32 1.0, %v111_v61  ;;  %v142_v6 = vsub.f32 1.0, %v110_v62  ;;  %v112_v8 = vld [vmem:[%s1550_s3 + $0xf0] sm:$0xff]  ;;  %v145_v11 = vsub.f32 1.0, %v113_v7 }
  0x20   :  { %v144_v12 = vsub.f32 1.0, %v112_v8  ;;  %v1073_v13 = vld [vmem:[%s1549_s0 + $0x70] ss:$8 sps:$4 sm:$0xff]  }
  0x21   :  { %659 = vperm.xlu1 %1010, %v581_v3   ;;  %654 = vperm.xlu0 %1009, %v580_v4   ;;  %v597_v3 = vmul.f32 1e+20, %v141_v59  ;;  %v596_v4 = vmul.f32 1e+20, %v140_v60  ;;  %v1074_v14 = vld [vmem:[%s1549_s0 + $0xf0] ss:$8 sps:$4 sm:$0xff]  }
  0x22   :  { %442 = vmatmul.mubr.bf16.vlgmr.msra.gmra.mrb[0].mxu0 %v1027_v29  ;;  %506 = vmatmul.mubr.bf16.vlgmr.msra.gmra.mrb[0].mxu1 %v1030_v30  ;;  %v103_v29 = vld [vmem:[%s1550_s3 + $0xa8] sm:$0xff]  ;;  %v102_v30 = vld [vmem:[%s1550_s3 + $0xa0] sm:$0xff] }
  0x23   :  { %449 = vmatprep.mubr.bf16.mxu0 %v1033_v32  ;;  %513 = vmatprep.mubr.bf16.mxu1 %v1035_v33  ;;  %v1056_v32 = vld [vmem:[%s1549_s0 + $0xc0] ss:$8 sps:$4 sm:$0xff]   ;;  %v1057_v33 = vld [vmem:[%s1549_s0 + $0x54] ss:$8 sps:$4 sm:$0xff]   ;;  %v135_v37 = vsub.f32 1.0, %v103_v29  ;;  %v134_v38 = vsub.f32 1.0, %v102_v30 }
  0x25   :  { %669 = vperm.xlu1 %1010, %v583_v9   ;;  %664 = vperm.xlu0 %1009, %v582_v10   ;;  %v591_v41 = vmul.f32 1e+20, %v135_v37  ;;  %v599_v9 = vmul.f32 1e+20, %v143_v5  ;;  %v598_v10 = vmul.f32 1e+20, %v142_v6 }
  0x29   :  { %679 = vperm.xlu1 %1010, %v585_v19   ;;  %674 = vperm.xlu0 %1009, %v584_v20  }
  0x2a   :  { %450 = vmatmul.mubr.bf16.gmra.mrb[4].mxu0 %v1037_v42  ;;  %514 = vmatmul.mubr.bf16.gmra.mrb[4].mxu1 %v1038_v43  ;;  %v590_v42 = vmul.f32 1e+20, %v134_v38  ;;  %v137_v43 = vsub.f32 1.0, %v105_v39 }
  0x2b   :  { %457 = vmatprep.mubr.bf16.mxu0 %v1039_v47  ;;  %521 = vmatprep.mubr.bf16.mxu1 %v1041_v50  ;;  %v1061_v47 = vld [vmem:[%s1549_s0 + $0x50] ss:$8 sps:$4 sm:$0xff]   ;;  %v1065_v50 = vld [vmem:[%s1549_s0 + $0xe4] ss:$8 sps:$4 sm:$0xff]  }
  0x2c   :  { %v593_v51 = vmul.f32 1e+20, %v137_v43 }
  0x2d   :  { %689 = vperm.xlu1 %1010, %v587_v25   ;;  %684 = vperm.xlu0 %1009, %v586_v26  }
  0x31   :  { %699 = vperm.xlu1 %1010, %v589_v35   ;;  %694 = vperm.xlu0 %1009, %v588_v36   ;;  %v1372_v35 = vld [vmem:[%s1551_s2] ss:$0 sm:$0xff] }
  0x32   :  { %458 = vmatmul.mubr.bf16.gmra.mrb[8].mxu0 %v1043_v63  ;;  %522 = vmatmul.mubr.bf16.gmra.mrb[8].mxu1 %v1044_v0  ;;  %v1067_v63 = vld [vmem:[%s1549_s0 + $0x60] ss:$8 sps:$4 sm:$0xff]  }
  0x33   :  { %465 = vmatprep.mubr.bf16.mxu0 %v1045_v1  ;;  %529 = vmatprep.mubr.bf16.mxu1 %v1047_v2  ;;  %v1068_v0 = vld [vmem:[%s1549_s0 + $0xe0] ss:$8 sps:$4 sm:$0xff]   ;;  %v1069_v1 = vld [vmem:[%s1549_s0 + $0x74] ss:$8 sps:$4 sm:$0xff]  }
  0x34   :  { %v1071_v2 = vld [vmem:[%s1549_s0 + $0xf4] ss:$8 sps:$4 sm:$0xff]  }
  0x35   :  { %709 = vperm.xlu1 %1010, %v591_v41   ;;  %704 = vperm.xlu0 %1009, %v590_v42  }
  0x39   :  { %719 = vperm.xlu1 %1010, %v593_v51   ;;  %714 = vperm.xlu0 %1009, %v592_v52  }
  0x3a   :  { %466 = vmatmul.mubr.bf16.gmra.mrb[12].mxu0 %v1049_v15  ;;  %530 = vmatmul.mubr.bf16.gmra.mrb[12].mxu1 %v1050_v16  ;;  %v601_v15 = vmul.f32 1e+20, %v145_v11  ;;  %v600_v16 = vmul.f32 1e+20, %v144_v12 }
  0x3b   :  { %473 = vmatprep.mubr.bf16.mxu0 %v1051_v17  ;;  %537 = vmatprep.mubr.bf16.mxu1 %v1053_v18 }
  0x3d   :  { %729 = vperm.xlu1 %1010, %v595_v57   ;;  %724 = vperm.xlu0 %1009, %v594_v58  }
  0x41   :  { %739 = vperm.xlu1 %1010, %v597_v3   ;;  %734 = vperm.xlu0 %1009, %v596_v4  }
  0x42   :  { %474 = vmatmul.mubr.bf16.gmra.mrb[16].mxu0 %v1055_v31  ;;  %538 = vmatmul.mubr.bf16.gmra.mrb[16].mxu1 %v1056_v32 }
  0x43   :  { %481 = vmatprep.mubr.bf16.mxu0 %v1057_v33  ;;  %545 = vmatprep.mubr.bf16.mxu1 %v1059_v34 }
  0x45   :  { %749 = vperm.xlu1 %1010, %v599_v9   ;;  %744 = vperm.xlu0 %1009, %v598_v10  }
  0x49   :  { %759 = vperm.xlu1 %1010, %v601_v15   ;;  %754 = vperm.xlu0 %1009, %v600_v16  }
  0x4a   :  { %482 = vmatmul.mubr.bf16.gmra.mrb[20].mxu0 %v1061_v47  ;;  %546 = vmatmul.mubr.bf16.gmra.mrb[20].mxu1 %v1062_v48 }
  0x4b   :  { %489 = vmatprep.mubr.bf16.mxu0 %v1063_v49  ;;  %553 = vmatprep.mubr.bf16.mxu1 %v1065_v50 }
  0x52   :  { %490 = vmatmul.mubr.bf16.gmra.mrb[24].mxu0 %v1067_v63  ;;  %554 = vmatmul.mubr.bf16.gmra.mrb[24].mxu1 %v1068_v0 }
  0x53   :  { %497 = vmatprep.mubr.bf16.mxu0 %v1069_v1  ;;  %561 = vmatprep.mubr.bf16.mxu1 %v1071_v2 }
  0x5a   :  { %498 = vmatmul.mubr.bf16.gmra.mrb[28].mxu0 %v1073_v13  ;;  %562 = vmatmul.mubr.bf16.gmra.mrb[28].mxu1 %v1074_v14 }
  0x8c   :  { %v1341_v17 = vpop.permute.xlu1 %614  ;;  %v605_v18 = vpop.permute.xlu0 %604 }
  0x90   :  { %v1343_v19 = vpop.permute.xlu1 %619  ;;  %v610_v20 = vpop.permute.xlu0 %609 }
  0x94   :  { %v1345_v21 = vpop.permute.xlu1 %629  ;;  %v1347_v22 = vpop.permute.xlu0 %624 }
  0x98   :  { %v1349_v23 = vpop.permute.xlu1 %639  ;;  %v1351_v24 = vpop.permute.xlu0 %634 }
  0x9c   :  { %v1353_v25 = vpop.permute.xlu1 %649  ;;  %v1355_v26 = vpop.permute.xlu0 %644 }
  0xa0   :  { %v1357_v27 = vpop.permute.xlu1 %659  ;;  %v1359_v28 = vpop.permute.xlu0 %654 }
  0xa4   :  { %v1361_v29 = vpop.permute.xlu1 %669  ;;  %v1363_v30 = vpop.permute.xlu0 %664 }
  0xa8   :  { %v1365_v31 = vpop.permute.xlu1 %679  ;;  %v1367_v32 = vpop.permute.xlu0 %674 }
  0xac   :  { %v685_v48 = vpop.permute.xlu0 %684  ;;  %v690_v53 = vpop.permute.xlu1 %689 }
  0xb0   :  { %v695_v6 = vpop.permute.xlu0 %694  ;;  %v700_v11 = vpop.permute.xlu1 %699 }
  0xf5   :  { %v896_v33 = vpop.f32.mrb[0].mxu0  ;;  %v944_v34 = vpop.f32.mrb[0].mxu1 }
  0xf6   :  { %v897_v36 = vpop.f32.mrb[1].mxu0  ;;  %v945_v37 = vpop.f32.mrb[1].mxu1 }
  0xf7   :  { %v898_v38 = vadd.f32 %v897_v36, %v896_v33  ;;  %v946_v39 = vadd.f32 %v945_v37, %v944_v34  ;;  %v899_v40 = vpop.f32.mrb[2].mxu0  ;;  %v947_v41 = vpop.f32.mrb[2].mxu1 }
  0xf8   :  { %v900_v42 = vpop.f32.mrb[3].mxu0  ;;  %v948_v43 = vpop.f32.mrb[3].mxu1 }
  0xf9   :  { %v444_v44 = vadd.f32 %v898_v38, %v1372_v35  ;;  %v508_v45 = vadd.f32 %v946_v39, %v1372_v35  ;;  %v901_v46 = vadd.f32 %v900_v42, %v899_v40  ;;  %v949_v47 = vadd.f32 %v948_v43, %v947_v41  ;;  %v705_v41 = vpop.permute.xlu0 %704 }
  0xfb   :  { %v762_v49 = vsub.f32 %v444_v44, %v605_v18  ;;  %v778_v50 = vsub.f32 %v508_v45, %v685_v48  ;;  %v447_v51 = vadd.f32 %v901_v46, %v1372_v35  ;;  %v511_v52 = vadd.f32 %v949_v47, %v1372_v35  ;;  %v710_v46 = vpop.permute.xlu1 %709 }
  0xfd   :  { %795 = vst.msk [vmem:[%s1552_s4] sm:$0xff] %vm794_vm0, %v762_v49  ;;  %811 = vst.msk [vmem:[%s1552_s4 + $0x80] sm:$0xff] %vm794_vm0, %v778_v50  ;;  %v763_v54 = vsub.f32 %v447_v51, %v610_v20  ;;  %v779_v55 = vsub.f32 %v511_v52, %v690_v53  ;;  %v902_v56 = vpop.f32.mrb[4].mxu0  ;;  %v950_v57 = vpop.f32.mrb[4].mxu1 }
  0xfe   :  { %v903_v58 = vpop.f32.mrb[5].mxu0  ;;  %v951_v59 = vpop.f32.mrb[5].mxu1 }
  0xff   :  { %796 = vst.msk [vmem:[%s1552_s4 + $0x8] sm:$0xff] %vm794_vm0, %v763_v54  ;;  %812 = vst.msk [vmem:[%s1552_s4 + $0x88] sm:$0xff] %vm794_vm0, %v779_v55  ;;  %v904_v60 = vadd.f32 %v903_v58, %v902_v56  ;;  %v952_v61 = vadd.f32 %v951_v59, %v950_v57  ;;  %v905_v62 = vpop.f32.mrb[6].mxu0  ;;  %v953_v63 = vpop.f32.mrb[6].mxu1 }
 0x100   :  { %v906_v0 = vpop.f32.mrb[7].mxu0  ;;  %v954_v1 = vpop.f32.mrb[7].mxu1 }
 0x101   :  { %v452_v2 = vadd.f32 %v904_v60, %v1372_v35  ;;  %v516_v3 = vadd.f32 %v952_v61, %v1372_v35  ;;  %v907_v4 = vadd.f32 %v906_v0, %v905_v62  ;;  %v955_v5 = vadd.f32 %v954_v1, %v953_v63  ;;  %v715_v61 = vpop.permute.xlu0 %714 }
 0x103   :  { %v764_v7 = vsub.f32 %v452_v2, %v1341_v17  ;;  %v780_v8 = vsub.f32 %v516_v3, %v695_v6  ;;  %v455_v9 = vadd.f32 %v907_v4, %v1372_v35  ;;  %v519_v10 = vadd.f32 %v955_v5, %v1372_v35  ;;  %v720_v2 = vpop.permute.xlu1 %719 }
 0x105   :  { %797 = vst.msk [vmem:[%s1552_s4 + $0x10] sm:$0xff] %vm794_vm0, %v764_v7  ;;  %813 = vst.msk [vmem:[%s1552_s4 + $0x90] sm:$0xff] %vm794_vm0, %v780_v8  ;;  %v765_v12 = vsub.f32 %v455_v9, %v1343_v19  ;;  %v781_v13 = vsub.f32 %v519_v10, %v700_v11  ;;  %v908_v14 = vpop.f32.mrb[8].mxu0  ;;  %v956_v15 = vpop.f32.mrb[8].mxu1 }
 0x106   :  { %v909_v16 = vpop.f32.mrb[9].mxu0  ;;  %v957_v17 = vpop.f32.mrb[9].mxu1 }
 0x107   :  { %798 = vst.msk [vmem:[%s1552_s4 + $0x18] sm:$0xff] %vm794_vm0, %v765_v12  ;;  %814 = vst.msk [vmem:[%s1552_s4 + $0x98] sm:$0xff] %vm794_vm0, %v781_v13  ;;  %v910_v18 = vadd.f32 %v909_v16, %v908_v14  ;;  %v958_v20 = vadd.f32 %v957_v17, %v956_v15  ;;  %v911_v33 = vpop.f32.mrb[10].mxu0  ;;  %v959_v34 = vpop.f32.mrb[10].mxu1 }
 0x108   :  { %v912_v19 = vpop.f32.mrb[11].mxu0  ;;  %v960_v36 = vpop.f32.mrb[11].mxu1 }
 0x109   :  { %v460_v37 = vadd.f32 %v910_v18, %v1372_v35  ;;  %v524_v38 = vadd.f32 %v958_v20, %v1372_v35  ;;  %v913_v39 = vadd.f32 %v912_v19, %v911_v33  ;;  %v961_v40 = vadd.f32 %v960_v36, %v959_v34  ;;  %v725_v17 = vpop.permute.xlu0 %724  ;;  %v730_v19 = vpop.permute.xlu1 %729 }
 0x10b   :  { %v766_v42 = vsub.f32 %v460_v37, %v1347_v22  ;;  %v782_v43 = vsub.f32 %v524_v38, %v705_v41  ;;  %v463_v44 = vadd.f32 %v913_v39, %v1372_v35  ;;  %v527_v45 = vadd.f32 %v961_v40, %v1372_v35 }
 0x10d   :  { %799 = vst.msk [vmem:[%s1552_s4 + $0x20] sm:$0xff] %vm794_vm0, %v766_v42  ;;  %815 = vst.msk [vmem:[%s1552_s4 + $0xa0] sm:$0xff] %vm794_vm0, %v782_v43  ;;  %v767_v47 = vsub.f32 %v463_v44, %v1345_v21  ;;  %v783_v48 = vsub.f32 %v527_v45, %v710_v46  ;;  %v914_v22 = vpop.f32.mrb[12].mxu0  ;;  %v962_v49 = vpop.f32.mrb[12].mxu1 }
 0x10e   :  { %v915_v50 = vpop.f32.mrb[13].mxu0  ;;  %v963_v51 = vpop.f32.mrb[13].mxu1 }
 0x10f   :  { %800 = vst.msk [vmem:[%s1552_s4 + $0x28] sm:$0xff] %vm794_vm0, %v767_v47  ;;  %816 = vst.msk [vmem:[%s1552_s4 + $0xa8] sm:$0xff] %vm794_vm0, %v783_v48  ;;  %v916_v52 = vadd.f32 %v915_v50, %v914_v22  ;;  %v964_v53 = vadd.f32 %v963_v51, %v962_v49  ;;  %v917_v54 = vpop.f32.mrb[14].mxu0  ;;  %v965_v55 = vpop.f32.mrb[14].mxu1 }
 0x110   :  { %v918_v21 = vpop.f32.mrb[15].mxu0  ;;  %v966_v56 = vpop.f32.mrb[15].mxu1 }
 0x111   :  { %v468_v57 = vadd.f32 %v916_v52, %v1372_v35  ;;  %v532_v58 = vadd.f32 %v964_v53, %v1372_v35  ;;  %v919_v59 = vadd.f32 %v918_v21, %v917_v54  ;;  %v967_v60 = vadd.f32 %v966_v56, %v965_v55  ;;  %v735_v49 = vpop.permute.xlu0 %734  ;;  %v740_v54 = vpop.permute.xlu1 %739 }
 0x113   :  { %v768_v62 = vsub.f32 %v468_v57, %v1351_v24  ;;  %v784_v63 = vsub.f32 %v532_v58, %v715_v61  ;;  %v471_v0 = vadd.f32 %v919_v59, %v1372_v35  ;;  %v535_v1 = vadd.f32 %v967_v60, %v1372_v35 }
 0x115   :  { %801 = vst.msk [vmem:[%s1552_s4 + $0x30] sm:$0xff] %vm794_vm0, %v768_v62  ;;  %817 = vst.msk [vmem:[%s1552_s4 + $0xb0] sm:$0xff] %vm794_vm0, %v784_v63  ;;  %v769_v3 = vsub.f32 %v471_v0, %v1349_v23  ;;  %v785_v4 = vsub.f32 %v535_v1, %v720_v2  ;;  %v920_v24 = vpop.f32.mrb[16].mxu0  ;;  %v968_v5 = vpop.f32.mrb[16].mxu1 }
 0x116   :  { %v921_v6 = vpop.f32.mrb[17].mxu0  ;;  %v969_v7 = vpop.f32.mrb[17].mxu1 }
 0x117   :  { %802 = vst.msk [vmem:[%s1552_s4 + $0x38] sm:$0xff] %vm794_vm0, %v769_v3  ;;  %818 = vst.msk [vmem:[%s1552_s4 + $0xb8] sm:$0xff] %vm794_vm0, %v785_v4  ;;  %v922_v8 = vadd.f32 %v921_v6, %v920_v24  ;;  %v970_v9 = vadd.f32 %v969_v7, %v968_v5  ;;  %v923_v10 = vpop.f32.mrb[18].mxu0  ;;  %v971_v11 = vpop.f32.mrb[18].mxu1 }
 0x118   :  { %v924_v23 = vpop.f32.mrb[19].mxu0  ;;  %v972_v12 = vpop.f32.mrb[19].mxu1 }
 0x119   :  { %v476_v13 = vadd.f32 %v922_v8, %v1372_v35  ;;  %v540_v14 = vadd.f32 %v970_v9, %v1372_v35  ;;  %v925_v15 = vadd.f32 %v924_v23, %v923_v10  ;;  %v973_v16 = vadd.f32 %v972_v12, %v971_v11  ;;  %v745_v4 = vpop.permute.xlu0 %744  ;;  %v750_v8 = vpop.permute.xlu1 %749 }
 0x11b   :  { %v770_v18 = vsub.f32 %v476_v13, %v1355_v26  ;;  %v786_v20 = vsub.f32 %v540_v14, %v725_v17  ;;  %v479_v33 = vadd.f32 %v925_v15, %v1372_v35  ;;  %v543_v34 = vadd.f32 %v973_v16, %v1372_v35 }
 0x11d   :  { %803 = vst.msk [vmem:[%s1552_s4 + $0x40] sm:$0xff] %vm794_vm0, %v770_v18  ;;  %819 = vst.msk [vmem:[%s1552_s4 + $0xc0] sm:$0xff] %vm794_vm0, %v786_v20  ;;  %v771_v36 = vsub.f32 %v479_v33, %v1353_v25  ;;  %v787_v37 = vsub.f32 %v543_v34, %v730_v19  ;;  %v926_v26 = vpop.f32.mrb[20].mxu0  ;;  %v974_v38 = vpop.f32.mrb[20].mxu1 }
 0x11e   :  { %v927_v39 = vpop.f32.mrb[21].mxu0  ;;  %v975_v40 = vpop.f32.mrb[21].mxu1 }
 0x11f   :  { %804 = vst.msk [vmem:[%s1552_s4 + $0x48] sm:$0xff] %vm794_vm0, %v771_v36  ;;  %820 = vst.msk [vmem:[%s1552_s4 + $0xc8] sm:$0xff] %vm794_vm0, %v787_v37  ;;  %v928_v41 = vadd.f32 %v927_v39, %v926_v26  ;;  %v976_v42 = vadd.f32 %v975_v40, %v974_v38  ;;  %v929_v43 = vpop.f32.mrb[22].mxu0  ;;  %v977_v44 = vpop.f32.mrb[22].mxu1 }
 0x120   :  { %v930_v25 = vpop.f32.mrb[23].mxu0  ;;  %v978_v45 = vpop.f32.mrb[23].mxu1 }
 0x121   :  { %v484_v46 = vadd.f32 %v928_v41, %v1372_v35  ;;  %v548_v47 = vadd.f32 %v976_v42, %v1372_v35  ;;  %v931_v48 = vadd.f32 %v930_v25, %v929_v43  ;;  %v979_v22 = vadd.f32 %v978_v45, %v977_v44  ;;  %v755_v19 = vpop.permute.xlu0 %754  ;;  %v760_v39 = vpop.permute.xlu1 %759 }
 0x123   :  { %v772_v50 = vsub.f32 %v484_v46, %v1359_v28  ;;  %v788_v51 = vsub.f32 %v548_v47, %v735_v49  ;;  %v487_v52 = vadd.f32 %v931_v48, %v1372_v35  ;;  %v551_v53 = vadd.f32 %v979_v22, %v1372_v35 }
 0x125   :  { %805 = vst.msk [vmem:[%s1552_s4 + $0x50] sm:$0xff] %vm794_vm0, %v772_v50  ;;  %821 = vst.msk [vmem:[%s1552_s4 + $0xd0] sm:$0xff] %vm794_vm0, %v788_v51  ;;  %v773_v55 = vsub.f32 %v487_v52, %v1357_v27  ;;  %v789_v21 = vsub.f32 %v551_v53, %v740_v54  ;;  %v932_v28 = vpop.f32.mrb[24].mxu0  ;;  %v980_v56 = vpop.f32.mrb[24].mxu1 }
 0x126   :  { %v933_v57 = vpop.f32.mrb[25].mxu0  ;;  %v981_v58 = vpop.f32.mrb[25].mxu1 }
 0x127   :  { %806 = vst.msk [vmem:[%s1552_s4 + $0x58] sm:$0xff] %vm794_vm0, %v773_v55  ;;  %822 = vst.msk [vmem:[%s1552_s4 + $0xd8] sm:$0xff] %vm794_vm0, %v789_v21  ;;  %v934_v59 = vadd.f32 %v933_v57, %v932_v28  ;;  %v982_v60 = vadd.f32 %v981_v58, %v980_v56  ;;  %v935_v61 = vpop.f32.mrb[26].mxu0  ;;  %v983_v62 = vpop.f32.mrb[26].mxu1 }
 0x128   :  { %v936_v27 = vpop.f32.mrb[27].mxu0  ;;  %v984_v63 = vpop.f32.mrb[27].mxu1 }
 0x129   :  { %v492_v0 = vadd.f32 %v934_v59, %v1372_v35  ;;  %v556_v1 = vadd.f32 %v982_v60, %v1372_v35  ;;  %v937_v2 = vadd.f32 %v936_v27, %v935_v61  ;;  %v985_v3 = vadd.f32 %v984_v63, %v983_v62 }
 0x12b   :  { %v774_v24 = vsub.f32 %v492_v0, %v1363_v30  ;;  %v790_v5 = vsub.f32 %v556_v1, %v745_v4  ;;  %v495_v6 = vadd.f32 %v937_v2, %v1372_v35  ;;  %v559_v7 = vadd.f32 %v985_v3, %v1372_v35 }
 0x12d   :  { %807 = vst.msk [vmem:[%s1552_s4 + $0x60] sm:$0xff] %vm794_vm0, %v774_v24  ;;  %823 = vst.msk [vmem:[%s1552_s4 + $0xe0] sm:$0xff] %vm794_vm0, %v790_v5  ;;  %v775_v9 = vsub.f32 %v495_v6, %v1361_v29  ;;  %v791_v10 = vsub.f32 %v559_v7, %v750_v8  ;;  %v938_v30 = vpop.f32.mrb[28].mxu0  ;;  %v986_v11 = vpop.f32.mrb[28].mxu1 }
 0x12e   :  { %v939_v23 = vpop.f32.mrb[29].mxu0  ;;  %v987_v12 = vpop.f32.mrb[29].mxu1 }
 0x12f   :  { %808 = vst.msk [vmem:[%s1552_s4 + $0x68] sm:$0xff] %vm794_vm0, %v775_v9  ;;  %824 = vst.msk [vmem:[%s1552_s4 + $0xe8] sm:$0xff] %vm794_vm0, %v791_v10  ;;  %v940_v13 = vadd.f32 %v939_v23, %v938_v30  ;;  %v988_v14 = vadd.f32 %v987_v12, %v986_v11  ;;  %v941_v15 = vpop.f32.mrb[30].mxu0  ;;  %v989_v16 = vpop.f32.mrb[30].mxu1 }
 0x130   :  { %v942_v29 = vpop.f32.mrb[31].mxu0  ;;  %v990_v17 = vpop.f32.mrb[31].mxu1 }
 0x131   :  { %v500_v18 = vadd.f32 %v940_v13, %v1372_v35  ;;  %v564_v20 = vadd.f32 %v988_v14, %v1372_v35  ;;  %v943_v33 = vadd.f32 %v942_v29, %v941_v15  ;;  %v991_v34 = vadd.f32 %v990_v17, %v989_v16 }
 0x133   :  { %v776_v36 = vsub.f32 %v500_v18, %v1367_v32  ;;  %v792_v37 = vsub.f32 %v564_v20, %v755_v19  ;;  %v503_v26 = vadd.f32 %v943_v33, %v1372_v35  ;;  %v567_v38 = vadd.f32 %v991_v34, %v1372_v35 }
 0x135   :  { %809 = vst.msk [vmem:[%s1552_s4 + $0x70] sm:$0xff] %vm794_vm0, %v776_v36  ;;  %825 = vst.msk [vmem:[%s1552_s4 + $0xf0] sm:$0xff] %vm794_vm0, %v792_v37  ;;  %v777_v40 = vsub.f32 %v503_v26, %v1365_v31  ;;  %v793_v41 = vsub.f32 %v567_v38, %v760_v39 }
 0x137   :  { %810 = vst.msk [vmem:[%s1552_s4 + $0x78] sm:$0xff] %vm794_vm0, %v777_v40  ;;  %826 = vst.msk [vmem:[%s1552_s4 + $0xf8] sm:$0xff] %vm794_vm0, %v793_v41 }

</bundles_post_ra>
